<compile_context>
chip_gen: v5e
topology: v5e:2x2
jax: 0.10.0
libtpu: 0.0.40
codegen_flags: <defaults>
</compile_context>

<pallas_src>
import jax
import jax.numpy as jnp
from jax.experimental import pallas as pl
from jax.experimental.pallas import tpu as pltpu


def _round_up(x: int, m: int) -> int:
    return ((x + m - 1) // m) * m


def _vmem_budget_bytes() -> int:
    """~75% of physical VMEM: ~48 MiB on v7x, ~96 MiB on v5e/v6e."""
    try:
        cap = int(pltpu.get_tpu_info().vmem_capacity_bytes)
    except Exception:  # not queryable -> conservative (v7x-safe) default
        cap = 64 << 20
    return max(min(cap * 3 // 4, 96 << 20), 16 << 20)


# ----------------------------- Pallas kernel --------------------------------
def _q_head_kernel(x_ref, w_ref, b_ref, o_ref):
    # x_ref: (TM, H) bf16 feature tile, w_ref: (H, TN) bf16 weight column tile,
    # b_ref: (1, TN) f32 bias tile, o_ref: (TM, TN) f32 output tile.
    acc = jnp.dot(x_ref[...], w_ref[...], preferred_element_type=jnp.float32)
    o_ref[...] = acc + b_ref[...]


def q_head_linear(features: jax.Array, weight_bf16: jax.Array,
                  bias_f32_row: jax.Array, n_out: int) -> jax.Array:
    """features: [M, H]; weight_bf16: [H, N_pad] bf16 (N_pad % 128 == 0,
    pre-padded at init); bias_f32_row: [1, N_pad] f32.  Returns [M, n_out] f32
    (bf16-streamed operands, f32 MXU accumulation)."""
    m, h = features.shape
    h2, n_pad = weight_bf16.shape
    assert h == h2 and n_pad % 128 == 0 and n_out <= n_pad

    budget = _vmem_budget_bytes()

    def footprint(tm, tn):
        # double-buffered feature / weight / output / (8-sublane) bias tiles
        return 2 * (tm * h * 2 + h * tn * 2 + tm * tn * 4 + 8 * tn * 4)

    def best_tn(tm, cap=2048):
        t = (min(cap, n_pad) // 128) * 128
        while t >= 128:
            if n_pad % t == 0 and footprint(tm, t) <= budget:
                return t
            t -= 128
        return None

    # Preferred layout: one M tile (features + output strip stay VMEM-resident)
    # -> the H x N weight is streamed from HBM exactly once.
    tm = _round_up(m, 16)
    tn = best_tn(tm)
    single_m_tile = tn is not None

    if single_m_tile:
        m_pad = tm
    else:
        # Fallback for very large M: tile M too, but put M on the INNER grid
        # axis so each (H, tn) weight tile stays resident across all M tiles
        # and only the (much smaller) feature matrix is re-streamed.
        tm = 256
        tn = best_tn(tm)
        while tn is None and tm > 16:
            tm //= 2
            tn = best_tn(tm)
        if tn is None:
            # TODO(synk): for extremely large H even minimal full-H blocks miss
            # the VMEM budget; that would need a K(H) grid axis with an f32
            # accumulator scratch.  Not reachable for realistic hidden sizes.
            tm, tn = 16, 128
        m_pad = _round_up(m, tm)

    x = features.astype(jnp.bfloat16)
    if m_pad != m:
        x = jnp.pad(x, ((0, m_pad - m), (0, 0)))

    n_steps = n_pad // tn
    vmem_limit = int(min(budget, max(2 * footprint(tm, tn), 16 << 20)))

    if single_m_tile:
        grid = (n_steps,)
        in_specs = [
            pl.BlockSpec((tm, h), lambda j: (0, 0)),     # features: resident
            pl.BlockSpec((h, tn), lambda j: (0, j)),     # weight: one HBM pass
            pl.BlockSpec((1, tn), lambda j: (0, j)),     # bias
        ]
        out_specs = pl.BlockSpec((tm, tn), lambda j: (0, j))
        dim_sem = ("parallel",)
        feat_bytes = m_pad * h * 2
    else:
        grid = (n_steps, m_pad // tm)                    # N outer, M inner
        in_specs = [
            pl.BlockSpec((tm, h), lambda j, i: (i, 0)),
            pl.BlockSpec((h, tn), lambda j, i: (0, j)),  # resident across M
            pl.BlockSpec((1, tn), lambda j, i: (0, j)),
        ]
        out_specs = pl.BlockSpec((tm, tn), lambda j, i: (i, j))
        dim_sem = ("parallel", "arbitrary")
        feat_bytes = n_steps * m_pad * h * 2             # features re-streamed

    cost = pl.CostEstimate(
        flops=2 * m_pad * h * n_pad,
        transcendentals=0,
        bytes_accessed=(feat_bytes + h * n_pad * 2
                        + m_pad * n_pad * 4 + n_pad * 4),
    )

    out = pl.pallas_call(
        _q_head_kernel,
        out_shape=jax.ShapeDtypeStruct((m_pad, n_pad), jnp.float32),
        grid_spec=pltpu.PrefetchScalarGridSpec(
            num_scalar_prefetch=0,
            grid=grid,
            in_specs=in_specs,
            out_specs=out_specs,
        ),
        compiler_params=pltpu.CompilerParams(
            dimension_semantics=dim_sem,
            vmem_limit_bytes=vmem_limit,
        ),
        cost_estimate=cost,
    )(x, weight_bf16, bias_f32_row)

    if m_pad != m or n_pad != n_out:
        out = out[:m, :n_out]
    return out


# --------------------------- Qfunction wrapper -------------------------------
class QfunctionJax:
    """JAX/Pallas analogue of Qfunction with q_head_type='linear'."""

    def __init__(self, hidden_size: int, vocab_size: int, num_q_heads: int,
                 key: jax.Array):
        self.hidden_size = hidden_size
        self.vocab_size = vocab_size
        self.num_q_heads = num_q_heads
        self.n_out = vocab_size * num_q_heads
        self.n_pad = _round_up(self.n_out, 128)

        k_emb, k_w, k_b = jax.random.split(key, 3)
        # Stub "base model": deterministic token-embedding table (glue, not kernel).
        self.embed = jax.random.normal(
            k_emb, (vocab_size, hidden_size), dtype=jnp.float32) * 0.02

        # q_head = nn.Linear(hidden_size, vocab_size * num_q_heads).
        # NOTE: the PyTorch __init__ zero-initializes these; small deterministic
        # random values keep the correctness check non-trivial.
        # Pad N to a 128 multiple and cast the weight to bf16 ONCE here so the
        # hot path never re-pads / re-casts the largest tensor.
        w = jax.random.normal(
            k_w, (hidden_size, self.n_out), dtype=jnp.float32) * 0.02
        b = jax.random.normal(k_b, (self.n_out,), dtype=jnp.float32) * 0.02
        pad_n = self.n_pad - self.n_out
        if pad_n:
            w = jnp.pad(w, ((0, 0), (0, pad_n)))
            b = jnp.pad(b, ((0, pad_n),))
        self.q_head_weight = w.astype(jnp.bfloat16)          # [H, N_pad] bf16
        self.q_head_bias = b.reshape(1, self.n_pad)           # [1, N_pad] f32

    def _base_features(self, sequences: jax.Array,
                       attn_mask: jax.Array) -> jax.Array:
        # TODO(synk): the real base_model is a full transformer; this is a
        # deterministic embedding + causal mean-pool stand-in (plain JAX glue).
        emb = self.embed[sequences] * attn_mask[..., None].astype(jnp.float32)
        csum = jnp.cumsum(emb, axis=1)
        cnt = jnp.cumsum(attn_mask.astype(jnp.float32), axis=1)[..., None]
        return csum / jnp.maximum(cnt, 1.0)  # [B, T, H]

    def forward(self, queries: jax.Array, query_attn_masks: jax.Array,
                responses: jax.Array):
        b, q_len = queries.shape
        t_resp = responses.shape[1]

        sequences = jnp.concatenate([queries, responses], axis=1)     # [B, T]
        attn_mask = jnp.concatenate(
            [query_attn_masks, jnp.ones_like(responses)], axis=1)      # [B, T]

        hidden = self._base_features(sequences, attn_mask)             # [B, T, H]
        # Hidden states aligned with response-token predictions:
        # positions [q_len-1, ..., T-2]  ->  [B, T_resp, H]
        last_hidden = jax.lax.dynamic_slice_in_dim(
            hidden, q_len - 1, t_resp, axis=1)

        feats = last_hidden.reshape(b * t_resp, self.hidden_size)      # [M, H]
        qvals_flat = q_head_linear(
            feats, self.q_head_weight, self.q_head_bias, self.n_out)   # [M, N]
        qvalues = qvals_flat.reshape(
            b, t_resp, self.num_q_heads, self.vocab_size)
        return {"qvalues": qvalues}


# --------------------------------- main --------------------------------------
if __name__ == "__main__":
    key = jax.random.PRNGKey(0)
    k_params, k_q, k_r = jax.random.split(key, 3)

    B = 2            # batch
    Q_LEN = 8        # query length
    R_LEN = 8        # response length
    HIDDEN = 32      # base-model hidden size
    VOCAB = 256      # len(base_tokenizer)
    NUM_Q_HEADS = 2

    model = QfunctionJax(HIDDEN, VOCAB, NUM_Q_HEADS, k_params)

    queries = jax.random.randint(k_q, (B, Q_LEN), 0, VOCAB, dtype=jnp.int32)
    responses = jax.random.randint(k_r, (B, R_LEN), 0, VOCAB, dtype=jnp.int32)
    query_attn_masks = jnp.ones((B, Q_LEN), dtype=jnp.int32)

    out = model.forward(queries, query_attn_masks, responses)
    qvalues = jax.block_until_ready(out["qvalues"])
    assert qvalues.shape == (B, R_LEN, NUM_Q_HEADS, VOCAB)

    # Pure-JAX reference for the q_head hot path (same bf16 streaming, f32 acc).
    hidden = model._base_features(
        jnp.concatenate([queries, responses], axis=1),
        jnp.concatenate([query_attn_masks, jnp.ones_like(responses)], axis=1))
    feats = jax.lax.dynamic_slice_in_dim(hidden, Q_LEN - 1, R_LEN, axis=1)
    feats_bf = feats.reshape(B * R_LEN, HIDDEN).astype(jnp.bfloat16)
    n_out = VOCAB * NUM_Q_HEADS
    w_ref = model.q_head_weight[:, :n_out].astype(jnp.float32)
    b_ref = model.q_head_bias[0, :n_out]
    ref = (feats_bf.astype(jnp.float32) @ w_ref + b_ref).reshape(
        B, R_LEN, NUM_Q_HEADS, VOCAB)
    assert jnp.allclose(qvalues, ref, atol=1e-3, rtol=2e-2), (
        float(jnp.max(jnp.abs(qvalues - ref))))

    print("KERNEL_OK")
</pallas_src>

<mosaic_0001>
module attributes {stable_mosaic.version = 11 : i64} {
  func.func @_q_head_kernel(%arg0: i32, %arg1: memref<16x32xbf16, #tpu.memory_space<vmem>>, %arg2: memref<32x512xbf16, #tpu.memory_space<vmem>>, %arg3: memref<1x512xf32, #tpu.memory_space<vmem>>, %arg4: memref<16x512xf32, #tpu.memory_space<vmem>>) attributes {dimension_semantics = [#tpu.dimension_semantics<parallel>], iteration_bounds = array<i64: 1>, scalar_prefetch = 0 : i64, scratch_operands = 0 : i64, tpu.core_type = #tpu.core_type<tc>, window_params = [{pipeline_mode = #tpu.pipeline_mode<synchronous>, transform_indices = @transform_0, window_bounds = array<i64: 16, 32>}, {transform_indices = @transform_1, window_bounds = array<i64: 32, 512>}, {transform_indices = @transform_2, window_bounds = array<i64: 1, 512>}, {transform_indices = @transform_3, window_bounds = array<i64: 16, 512>}]} {
    %c0 = arith.constant 0 : index
    %c0_0 = arith.constant 0 : index
    %0 = vector.load %arg1[%c0, %c0_0] : memref<16x32xbf16, #tpu.memory_space<vmem>>, vector<16x32xbf16>
    %c0_1 = arith.constant 0 : index
    %c0_2 = arith.constant 0 : index
    %1 = vector.load %arg2[%c0_1, %c0_2] : memref<32x512xbf16, #tpu.memory_space<vmem>>, vector<32x512xbf16>
    %cst = arith.constant dense<0.000000e+00> : vector<16x512xf32>
    %2 = tpu.matmul %0, %1, %cst {dimension_numbers = #tpu.dot_dimension_numbers<[1], [0], [0], [1], [0, 0, 1, 1], [], []>} : vector<16x32xbf16>, vector<32x512xbf16>, vector<16x512xf32> -> vector<16x512xf32>
    %c0_3 = arith.constant 0 : index
    %c0_4 = arith.constant 0 : index
    %3 = vector.load %arg3[%c0_3, %c0_4] : memref<1x512xf32, #tpu.memory_space<vmem>>, vector<1x512xf32>
    %4 = vector.broadcast %3 : vector<1x512xf32> to vector<16x512xf32>
    %5 = arith.addf %2, %4 : vector<16x512xf32>
    %c0_5 = arith.constant 0 : index
    %c0_6 = arith.constant 0 : index
    %6 = vector.load %arg4[%c0_5, %c0_6] : memref<16x512xf32, #tpu.memory_space<vmem>>, vector<16x512xf32>
    tpu.vector_store %arg4[%c0_5, %c0_6], %5 {strides = array<i32>} : memref<16x512xf32, #tpu.memory_space<vmem>>, vector<16x512xf32>,
    return
  }
  func.func @transform_0(%arg0: i32) -> (i32, i32) {
    %c0_i32 = arith.constant 0 : i32
    %c0_i32_0 = arith.constant 0 : i32
    %c0_i32_1 = arith.constant 0 : i32
    return %c0_i32, %c0_i32_0 : i32, i32
  }
  func.func @transform_1(%arg0: i32) -> (i32, i32) {
    %c0_i32 = arith.constant 0 : i32
    %c0_i32_0 = arith.constant 0 : i32
    return %c0_i32, %arg0 : i32, i32
  }
  func.func @transform_2(%arg0: i32) -> (i32, i32) {
    %c0_i32 = arith.constant 0 : i32
    %c0_i32_0 = arith.constant 0 : i32
    return %c0_i32, %arg0 : i32, i32
  }
  func.func @transform_3(%arg0: i32) -> (i32, i32) {
    %c0_i32 = arith.constant 0 : i32
    %c0_i32_0 = arith.constant 0 : i32
    return %c0_i32, %arg0 : i32, i32
  }
}

</mosaic_0001>

<bundles_post_ra>
// kernel: tpu_custom_call.1
= control target key start
LH: loop header
LB: loop body
LE: loop exit
PB: predicated region body
PF: predicated region fallthrough
CT: control target
= control target key end

     0   :  { %8 = vsyncpa [#allocation3], 0  ;;  %s417_s0 = inlined_call_operand.hbm [shape: bf16[16,32], index: 0, kind: input, shape index: {}]   ;;  %s418_s1 = inlined_call_operand.hbm [shape: bf16[32,512], index: 1, kind: input, shape index: {}]   ;;  %s419_s2 = inlined_call_operand.hbm [shape: f32[1,512], index: 2, kind: input, shape index: {}]   ;;  %s420_s3 = inlined_call_operand.hbm [shape: f32[16,512], index: 3, kind: output, shape index: {}]  }
   0x1   :  { %9 = vsyncpa [#allocation6], 0  ;;  %s28_s14 = sshll.u32 %s418_s1, 4  ;;  %s29_s14 = int_to_ptr.hbm [resolvable:$true] %s28_s14 }
   0x2   :  { %10 = vsyncpa [#allocation4], 0  ;;  %s375_s15 = smov [#allocation5]   ;;  %s15_s19 = sshll.u32 %s417_s0, 4  ;;  %s16_s19 = int_to_ptr.hbm [resolvable:$true] %s15_s19 }
   0x3   :  { %s30_s16 = sshll.u32 %s375_s15, 4  ;;  %s376_s20 = smov 256   ;;  %s31_s16 = int_to_ptr.vmem [resolvable:$true] %s30_s16 }
   0x4   :  { %s377_s21 = smov 16   ;;  %s378_s22 = smov [#allocation2]  }
   0x5   :  { %36 = dma.hbm_to_vmem [thread:$0]  %s29_s14, 1024, %s31_s16, [#allocation6], %s376_s20, %s376_s20, %s377_s21  }
   0x6   :  { %s17_s23 = sshll.u32 %s378_s22, 4  ;;  %s379_s24 = smov 64   ;;  %s18_s23 = int_to_ptr.vmem [resolvable:$true] %s17_s23 }
   0x7   :  { %s380_s25 = smov 4   ;;  %s42_s27 = sshll.u32 %s419_s2, 4  ;;  %s43_s27 = int_to_ptr.hbm [resolvable:$true] %s42_s27 }
   0x8   :  { %23 = dma.hbm_to_vmem [thread:$0]  %s16_s19, 128, %s18_s23, [#allocation3], %s379_s24, %s379_s24, %s380_s25  }
   0x9   :  { %s381_s28 = smov [#allocation7]  }
   0xa   :  { %s44_s29 = sshll.u32 %s381_s28, 4  ;;  %s45_s29 = int_to_ptr.vmem [resolvable:$true] %s44_s29 }
   0xb   :  { %47 = dma.hbm_to_vmem [thread:$0]  %s43_s27, 64, %s45_s29, [#allocation6]  }
   0xc   :  { %369 = dma.done.wait [#allocation3], 128  }
   0xd   :  { %370 = vsyncadd [#allocation3], 4294967168 }
   0xe   :  { %371 = dma.done.wait [#allocation6], 1088  }
   0xf   :  { %372 = vsyncadd [#allocation6], 4294966208  ;;  %v236_v0 = vld [vmem:[#allocation5 + $0x20] sm:$0xf]  ;;  %v261_v1 = vld [vmem:[#allocation5 + $0x2c] sm:$0xf0] }
  0x10   :  { %v259_v2 = vld [vmem:[#allocation5 + $0x24] sm:$0xf]  ;;  %v237_v3 = vor.u32 %v261_v1, %v236_v0  ;;  %v238_v4 = vld [vmem:[#allocation5 + $0x30] sm:$0xf0]  ;;  %v244_v5 = vld [vmem:[#allocation5 + $0x28] sm:$0xf] }
  0x11   :  { %v262_v6 = vld [vmem:[#allocation5 + $0x34] sm:$0xf0]  ;;  %v241_v7 = vor.u32 %v259_v2, %v238_v4  ;;  %v260_v9 = vld [vmem:[#allocation5 + $0x2c] sm:$0xf]  ;;  %v246_v10 = vld [vmem:[#allocation5 + $0x38] sm:$0xf0] }
  0x12   :  { %v245_v8 = vor.u32 %v262_v6, %v244_v5  ;;  %v220_v11 = vld [vmem:[#allocation5] sm:$0xf]  ;;  %136 = vmatpush.bf16.msra.mxu0 %v237_v3  ;;  %v249_v12 = vor.u32 %v260_v9, %v246_v10  ;;  %v257_v13 = vld [vmem:[#allocation5 + $0xc] sm:$0xf0]  ;;  %v255_v14 = vld [vmem:[#allocation5 + $0x4] sm:$0xf] }
  0x13   :  { %v222_v15 = vld [vmem:[#allocation5 + $0x10] sm:$0xf0]  ;;  %150 = vmatpush.bf16.msra.mxu1 %v241_v7  ;;  %v221_v16 = vor.u32 %v257_v13, %v220_v11  ;;  %v228_v18 = vld [vmem:[#allocation5 + $0x8] sm:$0xf]  ;;  %v258_v19 = vld [vmem:[#allocation5 + $0x14] sm:$0xf0] }
  0x14   :  { %164 = vmatpush.bf16.msra.mxu2 %v245_v8  ;;  %v225_v17 = vor.u32 %v255_v14, %v222_v15  ;;  %v256_v20 = vld [vmem:[#allocation5 + $0xc] sm:$0xf]  ;;  %178 = vmatpush.bf16.msra.mxu3 %v249_v12  ;;  %v229_v21 = vor.u32 %v258_v19, %v228_v18  ;;  %v230_v22 = vld [vmem:[#allocation5 + $0x18] sm:$0xf0]  ;;  %vm126_vm0 = vcmask 261120   ;;  %s382_s0 = smov [#allocation8]  }
  0x15   :  { %v233_v23 = vor.u32 %v256_v20, %v230_v22  ;;  %v254_v24 = vld [vmem:[#allocation2] sm:$0xff]  ;;  %v71_v25 = vld [vmem:[#allocation7] sm:$0xf]  ;;  %s198_s2 = sshll.u32 %s382_s0, 4  ;;  %s200_s5 = sshll.u32 %s420_s3, 4  ;;  %s199_s2 = int_to_ptr.vmem [resolvable:$true] %s198_s2  ;;  %s201_s5 = int_to_ptr.hbm [resolvable:$true] %s200_s5 }
  0x16   :  { %137 = vmatpush.bf16.msra.mxu0 %v221_v16  ;;  %v73_v26 = vperm.slane %v71_v25, 0  ;;  %v74_v27 = vperm.slane %v71_v25, 1  ;;  %v75_v32 = vperm.slane %v71_v25, 2  ;;  %v76_v33 = vperm.slane %v71_v25, 3  ;;  %s383_s6 = smov 512   ;;  %s384_s7 = smov 32  }
  0x17   :  { %151 = vmatpush.bf16.msra.mxu1 %v225_v17 }
  0x18   :  { %165 = vmatpush.bf16.msra.mxu2 %v229_v21  ;;  %179 = vmatpush.bf16.msra.mxu3 %v233_v23 }
  0x19   :  { %250 = vmatmul.msk.bf16.vlgmr.msra.gmra.mxu0 %vm126_vm0, %v254_v24 }
  0x1a   :  { %251 = vmatmul.msk.bf16.vlgmr.msra.gmra.mxu1 %vm126_vm0, %v254_v24 }
  0x1b   :  { %252 = vmatmul.msk.bf16.vlgmr.msra.gmra.mxu2 %vm126_vm0, %v254_v24  ;;  %253 = vmatmul.msk.bf16.vlgmr.msra.gmra.mxu3 %vm126_vm0, %v254_v24 }
  0x96   :  { %v139_v28 = vpop.f32.mrf.mxu0 }
  0x97   :  { %v140_v29 = vadd.f32 %v139_v28, %v73_v26  ;;  %v153_v30 = vpop.f32.mrf.mxu1 }
  0x98   :  { %v154_v31 = vadd.f32 %v153_v30, %v74_v27 }
  0x99   :  { %186 = vst [vmem:[#allocation8] sm:$0xff] %v140_v29 }
  0x9a   :  { %187 = vst [vmem:[#allocation8 + $0x8] sm:$0xff] %v154_v31 }
  0x9e   :  { %v167_v34 = vpop.f32.mrf.mxu2  ;;  %v181_v36 = vpop.f32.mrf.mxu3 }
  0x9f   :  { %v168_v35 = vadd.f32 %v167_v34, %v75_v32  ;;  %v141_v37 = vpop.f32.mrf.mxu0  ;;  %v182_v38 = vadd.f32 %v181_v36, %v76_v33  ;;  %v155_v40 = vpop.f32.mrf.mxu1 }
  0xa0   :  { %v142_v39 = vadd.f32 %v141_v37, %v73_v26  ;;  %v156_v41 = vadd.f32 %v155_v40, %v74_v27 }
  0xa1   :  { %188 = vst [vmem:[#allocation8 + $0x10] sm:$0xff] %v168_v35 }
  0xa2   :  { %189 = vst [vmem:[#allocation8 + $0x18] sm:$0xff] %v182_v38 }
  0xa3   :  { %190 = vst [vmem:[#allocation8 + $0x20] sm:$0xff] %v142_v39 }
  0xa4   :  { %191 = vst [vmem:[#allocation8 + $0x28] sm:$0xff] %v156_v41 }
  0xa6   :  { %v169_v42 = vpop.f32.mrf.mxu2  ;;  %v183_v44 = vpop.f32.mrf.mxu3 }
  0xa7   :  { %v170_v43 = vadd.f32 %v169_v42, %v75_v32  ;;  %v184_v45 = vadd.f32 %v183_v44, %v76_v33 }
  0xa9   :  { %192 = vst [vmem:[#allocation8 + $0x30] sm:$0xff] %v170_v43 }
  0xaa   :  { %193 = vst [vmem:[#allocation8 + $0x38] sm:$0xff] %v184_v45 }
  0xab   :  { %206 = dma.vmem_to_hbm [thread:$0]  %s199_s2, 1024, %s201_s5, [#allocation4], %s383_s6, %s383_s6, %s384_s7  }
  0xac   :  { %373 = dma.done.wait [#allocation4], 1024  }
  0xad   :  { %374 = vsyncadd [#allocation4], 4294966272 }
  0xae   :  { %211 = vsyncpa [#allocation3], 1 }
  0xaf   :  { %212 = vsyncpa [#allocation6], 1 }
  0xb0   :  { %213 = vsyncpa [#allocation4], 1 }

</bundles_post_ra>
